<compile_context>
chip_gen: v7x
topology: tpu7x:2x2x1
jax: 0.10.0
libtpu: 0.0.40
codegen_flags: <defaults>
</compile_context>

<pallas_src>
import functools

import jax
import jax.numpy as jnp
from jax.experimental import pallas as pl
from jax.experimental.pallas import tpu as pltpu


def _round_up(x, m):
    return ((x + m - 1) // m) * m


def _seq_pool_kernel(seq_ref, len_ref, out_ref, acc_ref, *, mode, seq_maxlen, guard_tail):
    """Accumulate one (bb, tt, E) time-tile of sequences into a (bb, 1, E) accumulator."""
    bb, tt, E = seq_ref.shape
    t_step = pl.program_id(1)

    @pl.when(t_step == 0)
    def _init():
        if mode == "max":
            acc_ref[...] = jnp.full(acc_ref.shape, -jnp.inf, dtype=jnp.float32)
        else:
            acc_ref[...] = jnp.zeros(acc_ref.shape, dtype=jnp.float32)

    # Load in native dtype, cast to f32 for the accumulation math.
    seq = seq_ref[...].astype(jnp.float32)          # (bb, tt, E)
    lens = len_ref[...]                             # (bb, 1, 1) int32

    # valid[b, t, e] = (global_t < seq_len[b]); built in-kernel, int compare + select
    # (no materialized HBM mask, no f32 mask temporaries).
    t_idx = jax.lax.broadcasted_iota(jnp.int32, (bb, tt, E), 1) + t_step * tt
    valid = t_idx < lens
    if guard_tail:
        # Last T-tile may extend past T when T % tt != 0: mask those garbage rows.
        valid = jnp.logical_and(valid, t_idx < seq_maxlen)

    if mode == "max":
        hist = jnp.where(valid, seq, jnp.float32(-1.0e9))
        acc_ref[...] = jnp.maximum(acc_ref[...], jnp.max(hist, axis=1, keepdims=True))
    else:
        acc_ref[...] = acc_ref[...] + jnp.sum(
            jnp.where(valid, seq, jnp.float32(0.0)), axis=1, keepdims=True)

    @pl.when(t_step == pl.num_programs(1) - 1)
    def _finish():
        res = acc_ref[...]
        if mode == "mean":
            res = res / (lens.astype(jnp.float32) + 1.0e-8)
        out_ref[...] = res.astype(out_ref.dtype)


def _auto_blocks(B, T, E, itemsize, target_block_bytes):
    """Pick (bb, tt) so one seq block (with TPU (8,128) padding) is ~target bytes."""
    Ep = _round_up(max(E, 1), 128)          # lane padding
    Tp = _round_up(max(T, 1), 8)            # sublane padding of a full-T block

    # Time tile: keep full T unless even an 8-row batch block would exceed the target.
    if 8 * Tp * Ep * itemsize > target_block_bytes:
        tt = (target_block_bytes // (8 * Ep * itemsize)) // 8 * 8
        tt = int(max(8, min(tt, Tp)))
        if tt >= T:
            tt = T
    else:
        tt = T
    tt_pad = tt if tt % 8 == 0 else _round_up(tt, 8)

    # Batch block: fill up to the target, capped to keep double-buffered VMEM modest.
    per_row_bytes = tt_pad * Ep * itemsize
    bb = (target_block_bytes // per_row_bytes) // 8 * 8
    bb = int(max(8, min(512, bb)))
    if B >= 16:
        # Keep >= 2 grid steps on the "parallel" batch axis (v7x: 2 TensorCores/chip).
        bb = min(bb, _round_up(pl.cdiv(B, 2), 8))
    bb = max(1, min(bb, B))
    return bb, tt


def sequence_pooling(seq_value, seq_len, mode="mean", *, batch_block=None,
                     time_block=None, target_block_bytes=4 * 1024 * 1024):
    """SequencePoolingLayer forward (supports_masking=False path).

    seq_value: (B, T, E) float/bf16, seq_len: (B, 1) or (B,) int.
    Returns (B, 1, E) in seq_value's dtype.
    """
    if mode not in ("sum", "mean", "max"):
        raise ValueError("parameter mode should in [sum, mean, max]")
    # TODO(synk): supports_masking=True branch (arbitrary user-provided (B, T) mask)
    #             is not implemented; only the default lengths-based path is.

    B, T, E = seq_value.shape
    lens = jnp.asarray(seq_len).reshape(B, 1, 1).astype(jnp.int32)
    itemsize = jnp.dtype(seq_value.dtype).itemsize

    auto_bb, auto_tt = _auto_blocks(B, T, E, itemsize, target_block_bytes)
    bb = int(batch_block) if batch_block is not None else auto_bb
    tt = int(time_block) if time_block is not None else auto_tt
    bb = max(1, min(bb, B))
    if tt >= T:
        tt = T
    else:
        tt = max(8, (tt // 8) * 8)          # (8,128) rule on the 2nd-minor block dim

    nb = pl.cdiv(B, bb)
    nt = pl.cdiv(T, tt)
    guard_tail = (T % tt) != 0

    kernel = functools.partial(_seq_pool_kernel, mode=mode,
                               seq_maxlen=T, guard_tail=guard_tail)

    return pl.pallas_call(
        kernel,
        out_shape=jax.ShapeDtypeStruct((B, 1, E), seq_value.dtype),
        grid_spec=pltpu.PrefetchScalarGridSpec(
            num_scalar_prefetch=0,
            grid=(nb, nt),
            in_specs=[
                pl.BlockSpec((bb, tt, E), lambda b, t: (b, t, 0)),
                # lens block is independent of t -> fetched only when b changes.
                pl.BlockSpec((bb, 1, 1), lambda b, t: (b, 0, 0)),
            ],
            out_specs=pl.BlockSpec((bb, 1, E), lambda b, t: (b, 0, 0)),
            scratch_shapes=[pltpu.VMEM((bb, 1, E), jnp.float32)],
        ),
        compiler_params=pltpu.CompilerParams(
            dimension_semantics=("parallel", "arbitrary"),
            vmem_limit_bytes=32 * 1024 * 1024,
        ),
    )(seq_value, lens)


def _reference(seq, lens, mode):
    """Pure-JAX transcription of the PyTorch SequencePoolingLayer forward."""
    B, T, E = seq.shape
    seq = seq.astype(jnp.float32)
    lens2 = jnp.asarray(lens).reshape(B, 1)
    row = jnp.arange(T)
    mask = (row[None, None, :] < lens2[:, :, None]).astype(jnp.float32)  # (B, 1, T)
    mask = jnp.transpose(mask, (0, 2, 1))                                # (B, T, 1)
    mask = jnp.repeat(mask, E, axis=2)                                   # (B, T, E)
    if mode == "max":
        hist = seq - (1.0 - mask) * 1.0e9
        return jnp.max(hist, axis=1, keepdims=True)
    hist = jnp.sum(seq * mask, axis=1)                                   # (B, E)
    if mode == "mean":
        hist = hist / (lens2.astype(jnp.float32) + 1.0e-8)
    return hist[:, None, :]


if __name__ == "__main__":
    key = jax.random.PRNGKey(0)
    k1, k2, k3 = jax.random.split(key, 3)

    # Case 1: small demo shape, single block (auto block selection).
    B, T, E = 4, 8, 32
    seq_value = jax.random.normal(k1, (B, T, E), dtype=jnp.float32)
    seq_len = jnp.array([[3], [8], [1], [5]], dtype=jnp.int32)
    for mode in ("sum", "mean", "max"):
        out = jax.block_until_ready(sequence_pooling(seq_value, seq_len, mode=mode))
        ref = _reference(seq_value, seq_len, mode)
        assert out.shape == (B, 1, E), (mode, out.shape)
        assert jnp.allclose(out, ref, atol=1e-5, rtol=1e-5), f"mismatch vs reference ({mode})"

    # Case 2: force the tiled-T accumulator path + ragged batch/time edge blocks.
    B2, T2, E2 = 20, 40, 32
    seq_value2 = jax.random.normal(k2, (B2, T2, E2), dtype=jnp.float32)
    seq_len2 = jax.random.randint(k3, (B2, 1), 1, T2 + 1).astype(jnp.int32)
    for mode in ("sum", "mean", "max"):
        out = jax.block_until_ready(
            sequence_pooling(seq_value2, seq_len2, mode=mode, batch_block=8, time_block=16))
        ref = _reference(seq_value2, seq_len2, mode)
        assert out.shape == (B2, 1, E2), (mode, out.shape)
        assert jnp.allclose(out, ref, atol=1e-5, rtol=1e-5), f"mismatch vs reference ({mode}, tiled)"

    print("KERNEL_OK")
</pallas_src>

<mosaic_0001>
module attributes {stable_mosaic.version = 11 : i64} {
  func.func @_seq_pool_kernel(%arg0: i32, %arg1: i32, %arg2: memref<4x8x32xf32, #tpu.memory_space<vmem>>, %arg3: memref<4x1x1xi32, #tpu.memory_space<vmem>>, %arg4: memref<4x1x32xf32, #tpu.memory_space<vmem>>, %arg5: memref<4x1x32xf32, #tpu.memory_space<vmem>>) attributes {dimension_semantics = [#tpu.dimension_semantics<parallel>, #tpu.dimension_semantics<arbitrary>], iteration_bounds = array<i64: 1, 1>, scalar_prefetch = 0 : i64, scratch_operands = 1 : i64, tpu.core_type = #tpu.core_type<tc>, window_params = [{transform_indices = @transform_0, window_bounds = array<i64: 4, 8, 32>}, {transform_indices = @transform_1, window_bounds = array<i64: 4, 1, 1>}, {transform_indices = @transform_2, window_bounds = array<i64: 4, 1, 32>}]} {
    %c0_i32 = arith.constant 0 : i32
    %0 = arith.cmpi eq, %arg1, %c0_i32 : i32
    %1 = arith.extui %0 : i1 to i32
    %c0_i32_0 = arith.constant 0 : i32
    %2 = arith.cmpi ne, %1, %c0_i32_0 : i32
    scf.if %2 {
      %cst_15 = arith.constant 0.000000e+00 : f32
      %21 = vector.broadcast %cst_15 : f32 to vector<4x1x32xf32>
      %c0_16 = arith.constant 0 : index
      %c0_17 = arith.constant 0 : index
      %c0_18 = arith.constant 0 : index
      %22 = vector.load %arg5[%c0_16, %c0_17, %c0_18] : memref<4x1x32xf32, #tpu.memory_space<vmem>>, vector<4x1x32xf32>
      tpu.vector_store %arg5[%c0_16, %c0_17, %c0_18], %21 {strides = array<i32>} : memref<4x1x32xf32, #tpu.memory_space<vmem>>, vector<4x1x32xf32>,
    } else {
    }
    %c0 = arith.constant 0 : index
    %c0_1 = arith.constant 0 : index
    %c0_2 = arith.constant 0 : index
    %3 = vector.load %arg2[%c0, %c0_1, %c0_2] : memref<4x8x32xf32, #tpu.memory_space<vmem>>, vector<4x8x32xf32>
    %c0_3 = arith.constant 0 : index
    %c0_4 = arith.constant 0 : index
    %c0_5 = arith.constant 0 : index
    %4 = vector.load %arg3[%c0_3, %c0_4, %c0_5] : memref<4x1x1xi32, #tpu.memory_space<vmem>>, vector<4x1x1xi32>
    %5 = tpu.iota {dimensions = array<i32: 1>} : vector<4x8x32xi32>
    %c8_i32 = arith.constant 8 : i32
    %6 = arith.muli %arg1, %c8_i32 : i32
    %7 = vector.broadcast %6 : i32 to vector<4x8x32xi32>
    %8 = arith.addi %5, %7 : vector<4x8x32xi32>
    %9 = vector.broadcast %4 : vector<4x1x1xi32> to vector<4x8x32xi32>
    %10 = arith.cmpi slt, %8, %9 : vector<4x8x32xi32>
    %c0_6 = arith.constant 0 : index
    %c0_7 = arith.constant 0 : index
    %c0_8 = arith.constant 0 : index
    %11 = vector.load %arg5[%c0_6, %c0_7, %c0_8] : memref<4x1x32xf32, #tpu.memory_space<vmem>>, vector<4x1x32xf32>
    %cst = arith.constant 0.000000e+00 : f32
    %12 = vector.broadcast %cst : f32 to vector<4x8x32xf32>
    %13 = arith.select %10, %3, %12 : vector<4x8x32xi1>, vector<4x8x32xf32>
    %cst_9 = arith.constant dense<0.000000e+00> : vector<4x32xf32>
    %14 = vector.multi_reduction <add>, %13, %cst_9 [1] : vector<4x8x32xf32> to vector<4x32xf32>
    %15 = vector.shape_cast %14 : vector<4x32xf32> to vector<4x1x32xf32>
    %16 = arith.addf %11, %15 : vector<4x1x32xf32>
    %c0_10 = arith.constant 0 : index
    %c0_11 = arith.constant 0 : index
    %c0_12 = arith.constant 0 : index
    %17 = vector.load %arg5[%c0_10, %c0_11, %c0_12] : memref<4x1x32xf32, #tpu.memory_space<vmem>>, vector<4x1x32xf32>
    tpu.vector_store %arg5[%c0_10, %c0_11, %c0_12], %16 {strides = array<i32>} : memref<4x1x32xf32, #tpu.memory_space<vmem>>, vector<4x1x32xf32>,
    %c0_i32_13 = arith.constant 0 : i32
    %18 = arith.cmpi eq, %arg1, %c0_i32_13 : i32
    %19 = arith.extui %18 : i1 to i32
    %c0_i32_14 = arith.constant 0 : i32
    %20 = arith.cmpi ne, %19, %c0_i32_14 : i32
    scf.if %20 {
      %c0_15 = arith.constant 0 : index
      %c0_16 = arith.constant 0 : index
      %c0_17 = arith.constant 0 : index
      %21 = vector.load %arg5[%c0_15, %c0_16, %c0_17] : memref<4x1x32xf32, #tpu.memory_space<vmem>>, vector<4x1x32xf32>
      %c0_18 = arith.constant 0 : index
      %c0_19 = arith.constant 0 : index
      %c0_20 = arith.constant 0 : index
      %22 = vector.load %arg4[%c0_18, %c0_19, %c0_20] : memref<4x1x32xf32, #tpu.memory_space<vmem>>, vector<4x1x32xf32>
      tpu.vector_store %arg4[%c0_18, %c0_19, %c0_20], %21 {strides = array<i32>} : memref<4x1x32xf32, #tpu.memory_space<vmem>>, vector<4x1x32xf32>,
    } else {
    }
    return
  }
  func.func @transform_0(%arg0: i32, %arg1: i32) -> (i32, i32, i32) {
    %c0_i32 = arith.constant 0 : i32
    %c0_i32_0 = arith.constant 0 : i32
    return %arg0, %arg1, %c0_i32 : i32, i32, i32
  }
  func.func @transform_1(%arg0: i32, %arg1: i32) -> (i32, i32, i32) {
    %c0_i32 = arith.constant 0 : i32
    %c0_i32_0 = arith.constant 0 : i32
    %c0_i32_1 = arith.constant 0 : i32
    return %arg0, %c0_i32, %c0_i32_0 : i32, i32, i32
  }
  func.func @transform_2(%arg0: i32, %arg1: i32) -> (i32, i32, i32) {
    %c0_i32 = arith.constant 0 : i32
    %c0_i32_0 = arith.constant 0 : i32
    %c0_i32_1 = arith.constant 0 : i32
    return %arg0, %c0_i32, %c0_i32_0 : i32, i32, i32
  }
}

</mosaic_0001>

<bundles_post_ra>
// kernel: tpu_custom_call.1
= control target key start
LH: loop header
LB: loop body
LE: loop exit
PB: predicated region body
PF: predicated region fallthrough
CT: control target
= control target key end

     0   :  { %7 = vsyncpa [#allocation4], 0  ;;  %s291_s0 = inlined_call_operand.hbm [shape: f32[4,8,32], index: 0, kind: input, shape index: {}]   ;;  %s292_s1 = inlined_call_operand.vmem [shape: s32[4,1,1], index: 1, kind: input, shape index: {}]   ;;  %s293_s2 = inlined_call_operand.hbm [shape: f32[4,1,32], index: 2, kind: output, shape index: {}]  }
   0x1   :  { %8 = vsyncpa [#allocation5], 0  ;;  %s216_s9 = smov [#allocation3]   ;;  %s168_s13 = scalar_lea.hbm %s291_s0, 512 }
   0x2   :  { %s14_s10 = sshll.u32 %s216_s9, 4  ;;  %p169_p0 = scmp.ne.s32.totalorder %s291_s0, %s168_s13  ;;  %s15_s10 = int_to_ptr.vmem [resolvable:$true] %s14_s10 }
   0x3   :  { %p172_p1 = scmp.lt.u32.totalorder %s168_s13, %s291_s0 }
   0x5   :  { %p174_p2 = pnand %p172_p1, %p169_p0 }
   0x7   :  { %177 = shalt.err (!%p174_p2)
}
   0x8   :  { %s178_s18 = scalar_lea.vmem %s15_s10, 512  ;;  %p183_p4 = scmp.lt.s32.totalorder %s15_s10, %s15_s10 }
   0x9   :  { %p179_p3 = scmp.ne.s32.totalorder %s15_s10, %s178_s18  ;;  %p184_p5 = scmp.lt.s32.totalorder %s178_s18, %s178_s18 }
   0xb   :  { %p185_p6 = por %p184_p5, %p183_p4 }
   0xd   :  { %p186_p7 = pnand %p185_p6, %p179_p3 }
   0xf   :  { %189 = shalt.err (!%p186_p7)
}
  0x10   :  { %s217_s19 = smov 128   ;;  %s218_s20 = smov 8  }
  0x11   :  { %20 = dma.hbm_to_vmem [thread:$0]  %s291_s0, 512, %s15_s10, [#allocation4], %s217_s19, %s217_s19, %s218_s20  }
  0x12   :  { %212 = dma.done.wait [#allocation4], 512  }
  0x13   :  { %213 = vsyncadd [#allocation4], 4294966784  ;;  %vm30_vm0 = vcmask 253952   ;;  %v219_v0 = vmov 0   ;;  %v220_v1 = vmov 0.0   ;;  %v43_v6 = vlaneseq  ;;  %v37_v8 = vld [vmem:[#allocation3 + $0x10] sm:$0xff] }
  0x14   :  { %167 = vset.pattern.permute.xlu1 %v219_v0  ;;  %166 = vset.pattern.permute.xlu0 %v219_v0  ;;  %33 = vst.msk [vmem:[#allocation2 + $0x2] sm:$0x1] %vm30_vm0, %v220_v1  ;;  %31 = vst.msk [vmem:[#allocation2] sm:$0x1] %vm30_vm0, %v220_v1  ;;  %v156_v2 = vld [vmem:[%s292_s1 + $0x2] ss:$0 sm:$0xff] }
  0x15   :  { %32 = vst.msk [vmem:[#allocation2 + $0x1] sm:$0x1] %vm30_vm0, %v220_v1  ;;  %34 = vst.msk [vmem:[#allocation2 + $0x3] sm:$0x1] %vm30_vm0, %v220_v1  ;;  %v154_v3 = vld [vmem:[%s292_s1] ss:$0 sm:$0xff]  ;;  %71 = vperm.xlu1 %167, %v156_v2  }
  0x16   :  { %65 = vperm.xlu0 %166, %v154_v3   ;;  %v157_v4 = vld [vmem:[%s292_s1 + $0x3] ss:$0 sm:$0xff]  ;;  %v155_v5 = vld [vmem:[%s292_s1 + $0x1] ss:$0 sm:$0xff]  ;;  %v44_v7 = vshrl.u32 %v43_v6, 7  ;;  %v35_v9 = vld [vmem:[#allocation3] sm:$0xff] }
  0x17   :  { %vm88_vm1 = vcmask 261120   ;;  %v38_v16 = vld [vmem:[#allocation3 + $0x18] sm:$0xff]  ;;  %v36_v17 = vld [vmem:[#allocation3 + $0x8] sm:$0xff]  ;;  %s221_s1 = smov [#allocation6]  }
  0x18   :  { %s142_s30 = sshll.u32 %s221_s1, 4  ;;  %s143_s30 = int_to_ptr.vmem [resolvable:$true] %s142_s30 }
  0x19   :  { %74 = vperm.xlu1 %167, %v157_v4   ;;  %s190_s3 = scalar_lea.vmem %s143_s30, 64  ;;  %p195_p9 = scmp.lt.s32.totalorder %s143_s30, %s143_s30 }
  0x1a   :  { %68 = vperm.xlu0 %166, %v155_v5   ;;  %p191_p8 = scmp.ne.s32.totalorder %s143_s30, %s190_s3  ;;  %p196_p10 = scmp.lt.s32.totalorder %s190_s3, %s190_s3 }
  0x1b   :  { %v82_v40 = vld [vmem:[#allocation2 + $0x2] sm:$0x1]  ;;  %v80_v41 = vld [vmem:[#allocation2] sm:$0x1] }
  0x1c   :  { %v83_v50 = vld [vmem:[#allocation2 + $0x3] sm:$0x1]  ;;  %v81_v51 = vld [vmem:[#allocation2 + $0x1] sm:$0x1]  ;;  %p197_p11 = por %p196_p10, %p195_p9 }
  0x1e   :  { %p198_p12 = pnand %p197_p11, %p191_p8 }
  0x94   :  { %v72_v10 = vpop.permute.xlu1 %71 }
  0x95   :  { %v66_v11 = vpop.permute.xlu0 %65  ;;  %vm78_vm2 = vcmp.lt.s32.totalorder %v44_v7, %v72_v10 }
  0x96   :  { %vm76_vm3 = vcmp.lt.s32.totalorder %v44_v7, %v66_v11  ;;  %v86_v12 = vsel %vm78_vm2, %v37_v8, 0.0 }
  0x97   :  { %v84_v13 = vsel %vm76_vm3, %v35_v9, 0.0  ;;  %v103_v14 = vsel %vm88_vm1, %v86_v12, 0.0 }
  0x98   :  { %v89_v15 = vsel %vm88_vm1, %v84_v13, 0.0  ;;  %v104_v18 = vrot.slane %v103_v14, 4  ;;  %v75_v20 = vpop.permute.xlu1 %74 }
  0x99   :  { %v90_v19 = vrot.slane %v89_v15, 4  ;;  %v69_v21 = vpop.permute.xlu0 %68  ;;  %vm79_vm4 = vcmp.lt.s32.totalorder %v44_v7, %v75_v20 }
  0x9a   :  { %vm77_vm5 = vcmp.lt.s32.totalorder %v44_v7, %v69_v21  ;;  %v105_v22 = vadd.f32 %v104_v18, %v103_v14  ;;  %v87_v24 = vsel %vm79_vm4, %v38_v16, 0.0 }
  0x9b   :  { %v91_v23 = vadd.f32 %v90_v19, %v89_v15  ;;  %v85_v25 = vsel %vm77_vm5, %v36_v17, 0.0  ;;  %v110_v26 = vsel %vm88_vm1, %v87_v24, 0.0 }
  0x9c   :  { %v96_v27 = vsel %vm88_vm1, %v85_v25, 0.0  ;;  %v106_v28 = vrot.slane %v105_v22, 2  ;;  %v111_v30 = vrot.slane %v110_v26, 4 }
  0x9d   :  { %v92_v29 = vrot.slane %v91_v23, 2  ;;  %v97_v31 = vrot.slane %v96_v27, 4 }
  0x9e   :  { %v107_v32 = vadd.f32 %v106_v28, %v105_v22  ;;  %v112_v34 = vadd.f32 %v111_v30, %v110_v26 }
  0x9f   :  { %v93_v33 = vadd.f32 %v92_v29, %v91_v23  ;;  %v98_v35 = vadd.f32 %v97_v31, %v96_v27 }
  0xa0   :  { %v108_v36 = vrot.slane %v107_v32, 1  ;;  %v113_v38 = vrot.slane %v112_v34, 2 }
  0xa1   :  { %v94_v37 = vrot.slane %v93_v33, 1  ;;  %v99_v39 = vrot.slane %v98_v35, 2 }
  0xa2   :  { %v109_v42 = vadd.f32 %v108_v36, %v107_v32  ;;  %v114_v44 = vadd.f32 %v113_v38, %v112_v34 }
  0xa3   :  { %v95_v43 = vadd.f32 %v94_v37, %v93_v33  ;;  %v100_v45 = vadd.f32 %v99_v39, %v98_v35 }
  0xa4   :  { %v119_v46 = vadd.f32 %v109_v42, %v82_v40  ;;  %v115_v48 = vrot.slane %v114_v44, 1 }
  0xa5   :  { %v117_v47 = vadd.f32 %v95_v43, %v80_v41  ;;  %v101_v49 = vrot.slane %v100_v45, 1 }
  0xa6   :  { %124 = vst.msk [vmem:[#allocation2 + $0x2] sm:$0x1] %vm30_vm0, %v119_v46  ;;  %v116_v52 = vadd.f32 %v115_v48, %v114_v44 }
  0xa7   :  { %122 = vst.msk [vmem:[#allocation2] sm:$0x1] %vm30_vm0, %v117_v47  ;;  %v102_v53 = vadd.f32 %v101_v49, %v100_v45 }
  0xa8   :  { %v120_v54 = vadd.f32 %v116_v52, %v83_v50 }
  0xa9   :  { %v118_v55 = vadd.f32 %v102_v53, %v81_v51 }
  0xaa   :  { %125 = vst.msk [vmem:[#allocation2 + $0x3] sm:$0x1] %vm30_vm0, %v120_v54 }
  0xab   :  { %123 = vst.msk [vmem:[#allocation2 + $0x1] sm:$0x1] %vm30_vm0, %v118_v55 }
  0xad   :  { %v131_v57 = vld [vmem:[#allocation2 + $0x2] sm:$0x1] }
  0xae   :  { %v129_v56 = vld [vmem:[#allocation2] sm:$0x1]  ;;  %135 = vst.msk [vmem:[#allocation6 + $0x2] sm:$0x1] %vm30_vm0, %v131_v57 }
  0xaf   :  { %133 = vst.msk [vmem:[#allocation6] sm:$0x1] %vm30_vm0, %v129_v56 }
  0xb1   :  { %v132_v59 = vld [vmem:[#allocation2 + $0x3] sm:$0x1] }
  0xb2   :  { %v130_v58 = vld [vmem:[#allocation2 + $0x1] sm:$0x1]  ;;  %136 = vst.msk [vmem:[#allocation6 + $0x3] sm:$0x1] %vm30_vm0, %v132_v59 }
  0xb3   :  { %134 = vst.msk [vmem:[#allocation6 + $0x1] sm:$0x1] %vm30_vm0, %v130_v58 }
  0xb4   :  { %201 = shalt.err (!%p198_p12)
}
  0xb5   :  { %s202_s6 = scalar_lea.hbm %s293_s2, 64 }
  0xb6   :  { %p203_p13 = scmp.ne.s32.totalorder %s293_s2, %s202_s6  ;;  %p206_p0 = scmp.lt.u32.totalorder %s202_s6, %s293_s2 }
  0xb8   :  { %p208_p1 = pnand %p206_p0, %p203_p13 }
  0xba   :  { %211 = shalt.err (!%p208_p1)
}
  0xbb   :  { %s222_s11 = smov 16   ;;  %s223_s12 = smov 1  }
  0xbc   :  { %148 = dma.vmem_to_hbm [thread:$0]  %s143_s30, 64, %s293_s2, [#allocation5], %s222_s11, %s222_s11, %s223_s12  }
  0xbd   :  { %214 = dma.done.wait [#allocation5], 64  }
  0xbe   :  { %215 = vsyncadd [#allocation5], 4294967232 }
  0xbf   :  { %152 = vsyncpa [#allocation4], 1 }
  0xc0   :  { %153 = vsyncpa [#allocation5], 1 }

</bundles_post_ra>
